<compile_context>
chip_gen: v6e
topology: v6e:2x2x1
jax: 0.10.0
libtpu: 0.0.40
codegen_flags: <defaults>
</compile_context>

<pallas_src>
import jax
import jax.numpy as jnp
from jax.experimental import pallas as pl
from jax.experimental.pallas import tpu as pltpu


def _roundup(x, m):
    return (x + m - 1) // m * m


def _largest_divisor_leq(n, cap):
    cap = max(1, min(n, int(cap)))
    for d in range(cap, 0, -1):
        if n % d == 0:
            return d
    return 1


def _per_buffer_budget_bytes():
    """Per-copy HBM->VMEM x-tile budget, by TPU generation."""
    try:
        kind = jax.devices()[0].device_kind.lower()
    except Exception:
        kind = ""
    if "v5 lite" in kind or "v5e" in kind or "v5litepod" in kind:
        return 4 << 20        # v5e: 16 MiB scoped default, ~0.82 TB/s HBM
    if "v6" in kind or "trillium" in kind:
        return 10 << 20       # v6e: plenty of VMEM; target >=85% HBM roofline
    if "v7" in kind:
        return 10 << 20       # v7x: 64 MiB physical; keep 2x tile + temps < 48 MiB
    return 8 << 20


def _make_ca_kernel(hw_total, t_hw, tb, chunk, n_hw):
    """Builds the kernel body for static (HW, t_hw, Tb, chunk, n_hw)."""
    n_int_full = t_hw // chunk
    int_tail = t_hw - n_int_full * chunk
    rem = hw_total - (n_hw - 1) * t_hw          # valid lanes in the last tile
    n_last_full = rem // chunk
    last_tail = rem - n_last_full * chunk
    inv_hw = 1.0 / float(hw_total)

    def kernel(x_ref, w1t_ref, w2t_ref, o_ref, sum_ref, max_ref):
        # x_ref  : (Tb, C, t_hw)   current spatial tile of this batch block
        # w1t_ref: (C, Cr)         fc1 weight, transposed
        # w2t_ref: (Cr, C)         fc2 weight, transposed
        # o_ref  : (Tb, 1, C)      lane-dense sigmoid channel attention
        # sum_ref/max_ref: (Tb, C) f32 running accumulators (persist across k)
        k = pl.program_id(1)

        @pl.when(k == 0)
        def _init():
            sum_ref[...] = jnp.zeros_like(sum_ref)
            max_ref[...] = jnp.full_like(max_ref, -jnp.inf)

        def accum_chunk(start, width):
            # Single read of the chunk; upcast to f32 feeds both reductions.
            xc = x_ref[:, :, pl.ds(start, width)].astype(jnp.float32)
            sum_ref[...] += jnp.sum(xc, axis=2)
            max_ref[...] = jnp.maximum(max_ref[...], jnp.max(xc, axis=2))

        def accum_range(n_full, tail):
            if n_full > 0:
                def body(j, carry):
                    accum_chunk(pl.multiple_of(j * chunk, chunk), chunk)
                    return carry
                jax.lax.fori_loop(0, n_full, body, 0,
                                  unroll=n_full if n_full <= 8 else 8)
            if tail > 0:
                # Ragged but fully valid tail: exact-width read, no masking.
                accum_chunk(n_full * chunk, tail)

        if rem == t_hw:
            # Every tile is fully valid (includes the batch-blocked n_hw == 1 case).
            accum_range(n_int_full, int_tail)
        else:
            @pl.when(k < n_hw - 1)
            def _interior():
                accum_range(n_int_full, int_tail)

            @pl.when(k == n_hw - 1)
            def _last():
                accum_range(n_last_full, last_tail)

        @pl.when(k == n_hw - 1)
        def _finalize():
            avg = sum_ref[...] * inv_hw                              # (Tb, C)
            mx = max_ref[...]                                        # (Tb, C)
            w1t = w1t_ref[...]                                       # (C, Cr)
            w2t = w2t_ref[...]                                       # (Cr, C)
            # relu(fc1(avg)) + relu(fc1(max)); fc2 applied once (linear, no bias).
            h = (jnp.maximum(jnp.dot(avg, w1t, preferred_element_type=jnp.float32), 0.0)
                 + jnp.maximum(jnp.dot(mx, w1t, preferred_element_type=jnp.float32), 0.0))
            out = jnp.dot(h, w2t, preferred_element_type=jnp.float32)  # (Tb, C)
            o_ref[...] = jax.nn.sigmoid(out).astype(o_ref.dtype).reshape(o_ref.shape)

    return kernel


def channel_attention_cbam(x, w1, w2, *, hw_tile=None):
    """x: (B, C, H, W) float32/bf16; w1: (C//16, C); w2: (C, C//16).
    Returns the sigmoid channel attention, shape (B, C, 1, 1), dtype of x."""
    B, C, H, W = x.shape
    HW = H * W
    Cr = w1.shape[0]
    assert w1.shape == (Cr, C) and w2.shape == (C, Cr), "unexpected weight shapes"

    x_flat = x.reshape(B, C, HW)
    w1t = jnp.asarray(w1, jnp.float32).T          # (C, Cr)
    w2t = jnp.asarray(w2, jnp.float32).T          # (Cr, C)
    itemsize = jnp.dtype(x.dtype).itemsize

    buf_budget = _per_buffer_budget_bytes()

    if hw_tile is not None:
        hw_tile = int(hw_tile)
        if hw_tile <= 0:
            raise ValueError(f"hw_tile must be positive, got {hw_tile}")
        tb = 1
        t_hw = HW if hw_tile >= HW else max(128, (hw_tile // 128) * 128)
    else:
        per_batch = C * _roundup(HW, 128) * itemsize
        if per_batch <= buf_budget:
            # Batch-blocked mode: whole image(s) per grid step.
            tb = _largest_divisor_leq(B, buf_budget // per_batch)
            t_hw = HW
        else:
            # Spatially tiled mode: size t_hw purely from the VMEM budget.
            tb = 1
            lanes = (buf_budget // (C * itemsize)) // 128 * 128
            t_hw = int(max(128, min(lanes, HW)))

    n_hw = pl.cdiv(HW, t_hw)
    n_b = B // tb

    # Sub-chunk size bounds in-kernel f32 temporaries to ~Tb*C*chunk*4 bytes.
    chunk = (512 * 1024) // max(1, tb * C * 4)
    chunk = int(max(128, min((chunk // 128) * 128, 2048, _roundup(t_hw, 128))))

    # VMEM accounting: double-buffered x tile + chunk temporaries + weights.
    x_bytes = 2 * tb * _roundup(C, 8) * _roundup(t_hw, 128) * itemsize
    tmp_bytes = 4 * tb * _roundup(C, 8) * chunk * 4
    w_bytes = 2 * 4 * (_roundup(C, 8) * _roundup(Cr, 128)
                       + _roundup(Cr, 8) * _roundup(C, 128))
    vmem_limit = int(min(48 << 20,
                         max(32 << 20, x_bytes + tmp_bytes + w_bytes + (4 << 20))))

    out = pl.pallas_call(
        _make_ca_kernel(HW, t_hw, tb, chunk, n_hw),
        out_shape=jax.ShapeDtypeStruct((B, 1, C), x.dtype),
        grid_spec=pltpu.PrefetchScalarGridSpec(
            num_scalar_prefetch=0,
            grid=(n_b, n_hw),
            in_specs=[
                pl.BlockSpec((tb, C, t_hw), lambda bi, k: (bi, 0, k)),
                pl.BlockSpec((C, Cr), lambda bi, k: (0, 0)),
                pl.BlockSpec((Cr, C), lambda bi, k: (0, 0)),
            ],
            out_specs=pl.BlockSpec((tb, 1, C), lambda bi, k: (bi, 0, 0)),
            scratch_shapes=[
                pltpu.VMEM((tb, C), jnp.float32),   # running sum
                pltpu.VMEM((tb, C), jnp.float32),   # running max
            ],
        ),
        compiler_params=pltpu.CompilerParams(
            dimension_semantics=("parallel", "arbitrary"),
            vmem_limit_bytes=vmem_limit),
    )(x_flat, w1t, w2t)

    # (B, 1, C) -> (B, C, 1, 1): pure metadata reshape, dtype already x.dtype.
    return out.reshape(B, C, 1, 1)


def _reference(x, w1, w2):
    # Pure-JAX reference matching the PyTorch forward.
    xf = x.astype(jnp.float32)
    avg = jnp.mean(xf, axis=(2, 3))                      # (B, C)
    mx = jnp.max(xf, axis=(2, 3))                        # (B, C)

    def mlp(v):
        h = jnp.maximum(v @ w1.T, 0.0)                   # (B, C//16)
        return h @ w2.T                                  # (B, C)

    out = jax.nn.sigmoid(mlp(avg) + mlp(mx))
    return out[:, :, None, None].astype(x.dtype)


if __name__ == "__main__":
    key = jax.random.PRNGKey(0)
    kx, k1, k2 = jax.random.split(key, 3)

    # in_planes must be a multiple of 16 (ratio=16 in the module).
    B, C, H, W = 2, 32, 16, 16
    x = jax.random.normal(kx, (B, C, H, W), dtype=jnp.float32)

    # fc1: Conv2d(C, C//16, 1, bias=False) -> weight (C//16, C, 1, 1) squeezed
    # fc2: Conv2d(C//16, C, 1, bias=False) -> weight (C, C//16, 1, 1) squeezed
    w1 = jax.random.normal(k1, (C // 16, C), dtype=jnp.float32) * (1.0 / C ** 0.5)
    w2 = jax.random.normal(k2, (C, C // 16), dtype=jnp.float32) * (1.0 / (C // 16) ** 0.5)

    # Case 1: default path (batch-blocked: whole feature maps per grid step).
    y = channel_attention_cbam(x, w1, w2)
    jax.block_until_ready(y)
    y_ref = _reference(x, w1, w2)
    assert y.shape == (B, C, 1, 1)
    assert jnp.allclose(y, y_ref, atol=1e-5, rtol=1e-5)

    # Case 2: spatially tiled path with a ragged last tile
    # (HW = 400, tile = 128 -> 4 grid steps, last step only 16 valid lanes).
    H2 = W2 = 20
    x2 = jax.random.normal(kx, (B, C, H2, W2), dtype=jnp.float32)
    y2 = channel_attention_cbam(x2, w1, w2, hw_tile=128)
    jax.block_until_ready(y2)
    y2_ref = _reference(x2, w1, w2)
    assert y2.shape == (B, C, 1, 1)
    assert jnp.allclose(y2, y2_ref, atol=1e-5, rtol=1e-5)

    # Case 3: multi-chunk inner loop + ragged tail
    # (HW = 6400, tile = 4096, chunk = 2048 -> 2 full chunks, then 1 + 256 tail).
    H3 = W3 = 80
    x3 = jax.random.normal(kx, (B, C, H3, W3), dtype=jnp.float32)
    y3 = channel_attention_cbam(x3, w1, w2, hw_tile=4096)
    jax.block_until_ready(y3)
    y3_ref = _reference(x3, w1, w2)
    assert y3.shape == (B, C, 1, 1)
    assert jnp.allclose(y3, y3_ref, atol=1e-5, rtol=1e-5)

    # Case 4: bf16 activations (halves HBM traffic), default batch-blocked path.
    xb = x.astype(jnp.bfloat16)
    yb = channel_attention_cbam(xb, w1, w2)
    jax.block_until_ready(yb)
    yb_ref = _reference(xb, w1, w2)
    assert yb.shape == (B, C, 1, 1) and yb.dtype == jnp.bfloat16
    assert jnp.allclose(yb.astype(jnp.float32), yb_ref.astype(jnp.float32),
                        atol=1e-2, rtol=1e-2)

    print("KERNEL_OK")
</pallas_src>

<mosaic_0001>
module attributes {stable_mosaic.version = 11 : i64} {
  func.func @kernel(%arg0: i32, %arg1: i32, %arg2: memref<2x32x256xf32, #tpu.memory_space<vmem>>, %arg3: memref<32x2xf32, #tpu.memory_space<vmem>>, %arg4: memref<2x32xf32, #tpu.memory_space<vmem>>, %arg5: memref<2x1x32xf32, #tpu.memory_space<vmem>>, %arg6: memref<2x32xf32, #tpu.memory_space<vmem>>, %arg7: memref<2x32xf32, #tpu.memory_space<vmem>>) attributes {dimension_semantics = [#tpu.dimension_semantics<parallel>, #tpu.dimension_semantics<arbitrary>], iteration_bounds = array<i64: 1, 1>, scalar_prefetch = 0 : i64, scratch_operands = 2 : i64, tpu.core_type = #tpu.core_type<tc>, window_params = [{transform_indices = @transform_0, window_bounds = array<i64: 2, 32, 256>}, {pipeline_mode = #tpu.pipeline_mode<synchronous>, transform_indices = @transform_1, window_bounds = array<i64: 32, 2>}, {pipeline_mode = #tpu.pipeline_mode<synchronous>, transform_indices = @transform_2, window_bounds = array<i64: 2, 32>}, {transform_indices = @transform_3, window_bounds = array<i64: 2, 1, 32>}]} {
    %c0_i32 = arith.constant 0 : i32
    %0 = arith.cmpi eq, %arg1, %c0_i32 : i32
    %1 = arith.extui %0 : i1 to i32
    %c0_i32_0 = arith.constant 0 : i32
    %2 = arith.cmpi ne, %1, %c0_i32_0 : i32
    scf.if %2 {
      %cst_14 = arith.constant 0.000000e+00 : f32
      %18 = vector.broadcast %cst_14 : f32 to vector<2x32xf32>
      %c0_15 = arith.constant 0 : index
      %c0_16 = arith.constant 0 : index
      %19 = vector.load %arg6[%c0_15, %c0_16] : memref<2x32xf32, #tpu.memory_space<vmem>>, vector<2x32xf32>
      tpu.vector_store %arg6[%c0_15, %c0_16], %18 {strides = array<i32>} : memref<2x32xf32, #tpu.memory_space<vmem>>, vector<2x32xf32>,
      %cst_17 = arith.constant 0xFF800000 : f32
      %20 = vector.broadcast %cst_17 : f32 to vector<2x32xf32>
      %c0_18 = arith.constant 0 : index
      %c0_19 = arith.constant 0 : index
      %21 = vector.load %arg7[%c0_18, %c0_19] : memref<2x32xf32, #tpu.memory_space<vmem>>, vector<2x32xf32>
      tpu.vector_store %arg7[%c0_18, %c0_19], %20 {strides = array<i32>} : memref<2x32xf32, #tpu.memory_space<vmem>>, vector<2x32xf32>,
    } else {
    }
    %c0_i32_1 = arith.constant 0 : i32
    %c256_i32 = arith.constant 256 : i32
    %3 = arith.muli %c0_i32_1, %c256_i32 : i32
    %4 = tpu.assume_multiple %3, 256 : i32
    %c0 = arith.constant 0 : index
    %c0_2 = arith.constant 0 : index
    %5 = arith.index_cast %4 : i32 to index
    %6 = vector.load %arg2[%c0, %c0_2, %5] : memref<2x32x256xf32, #tpu.memory_space<vmem>>, vector<2x32x256xf32>
    %c0_3 = arith.constant 0 : index
    %c0_4 = arith.constant 0 : index
    %7 = vector.load %arg6[%c0_3, %c0_4] : memref<2x32xf32, #tpu.memory_space<vmem>>, vector<2x32xf32>
    %cst = arith.constant dense<0.000000e+00> : vector<2x32xf32>
    %8 = vector.multi_reduction <add>, %6, %cst [2] : vector<2x32x256xf32> to vector<2x32xf32>
    %9 = arith.addf %7, %8 : vector<2x32xf32>
    %c0_5 = arith.constant 0 : index
    %c0_6 = arith.constant 0 : index
    %10 = vector.load %arg6[%c0_5, %c0_6] : memref<2x32xf32, #tpu.memory_space<vmem>>, vector<2x32xf32>
    tpu.vector_store %arg6[%c0_5, %c0_6], %9 {strides = array<i32>} : memref<2x32xf32, #tpu.memory_space<vmem>>, vector<2x32xf32>,
    %c0_7 = arith.constant 0 : index
    %c0_8 = arith.constant 0 : index
    %11 = vector.load %arg7[%c0_7, %c0_8] : memref<2x32xf32, #tpu.memory_space<vmem>>, vector<2x32xf32>
    %cst_9 = arith.constant dense<0xFF800000> : vector<2x32xf32>
    %12 = vector.multi_reduction <maximumf>, %6, %cst_9 [2] : vector<2x32x256xf32> to vector<2x32xf32>
    %13 = arith.maximumf %11, %12 : vector<2x32xf32>
    %c0_10 = arith.constant 0 : index
    %c0_11 = arith.constant 0 : index
    %14 = vector.load %arg7[%c0_10, %c0_11] : memref<2x32xf32, #tpu.memory_space<vmem>>, vector<2x32xf32>
    tpu.vector_store %arg7[%c0_10, %c0_11], %13 {strides = array<i32>} : memref<2x32xf32, #tpu.memory_space<vmem>>, vector<2x32xf32>,
    %c1_i32 = arith.constant 1 : i32
    %c0_i32_12 = arith.constant 0 : i32
    %15 = arith.cmpi eq, %arg1, %c0_i32_12 : i32
    %16 = arith.extui %15 : i1 to i32
    %c0_i32_13 = arith.constant 0 : i32
    %17 = arith.cmpi ne, %16, %c0_i32_13 : i32
    scf.if %17 {
      %c0_14 = arith.constant 0 : index
      %c0_15 = arith.constant 0 : index
      %18 = vector.load %arg6[%c0_14, %c0_15] : memref<2x32xf32, #tpu.memory_space<vmem>>, vector<2x32xf32>
      %cst_16 = arith.constant 3.906250e-03 : f32
      %19 = vector.broadcast %cst_16 : f32 to vector<2x32xf32>
      %20 = arith.mulf %18, %19 : vector<2x32xf32>
      %c0_17 = arith.constant 0 : index
      %c0_18 = arith.constant 0 : index
      %21 = vector.load %arg7[%c0_17, %c0_18] : memref<2x32xf32, #tpu.memory_space<vmem>>, vector<2x32xf32>
      %c0_19 = arith.constant 0 : index
      %c0_20 = arith.constant 0 : index
      %22 = vector.load %arg3[%c0_19, %c0_20] : memref<32x2xf32, #tpu.memory_space<vmem>>, vector<32x2xf32>
      %c0_21 = arith.constant 0 : index
      %c0_22 = arith.constant 0 : index
      %23 = vector.load %arg4[%c0_21, %c0_22] : memref<2x32xf32, #tpu.memory_space<vmem>>, vector<2x32xf32>
      %cst_23 = arith.constant dense<0.000000e+00> : vector<2x2xf32>
      %24 = tpu.matmul %20, %22, %cst_23 {dimension_numbers = #tpu.dot_dimension_numbers<[1], [0], [0], [1], [0, 0, 1, 1], [], []>} : vector<2x32xf32>, vector<32x2xf32>, vector<2x2xf32> -> vector<2x2xf32>
      %cst_24 = arith.constant 0.000000e+00 : f32
      %25 = vector.broadcast %cst_24 : f32 to vector<2x2xf32>
      %26 = arith.maximumf %24, %25 : vector<2x2xf32>
      %cst_25 = arith.constant dense<0.000000e+00> : vector<2x2xf32>
      %27 = tpu.matmul %21, %22, %cst_25 {dimension_numbers = #tpu.dot_dimension_numbers<[1], [0], [0], [1], [0, 0, 1, 1], [], []>} : vector<2x32xf32>, vector<32x2xf32>, vector<2x2xf32> -> vector<2x2xf32>
      %cst_26 = arith.constant 0.000000e+00 : f32
      %28 = vector.broadcast %cst_26 : f32 to vector<2x2xf32>
      %29 = arith.maximumf %27, %28 : vector<2x2xf32>
      %30 = arith.addf %26, %29 : vector<2x2xf32>
      %cst_27 = arith.constant dense<0.000000e+00> : vector<2x32xf32>
      %31 = tpu.matmul %30, %23, %cst_27 {dimension_numbers = #tpu.dot_dimension_numbers<[1], [0], [0], [1], [0, 0, 1, 1], [], []>} : vector<2x2xf32>, vector<2x32xf32>, vector<2x32xf32> -> vector<2x32xf32>
      %32 = arith.negf %31 : vector<2x32xf32>
      %33 = math.exp %32 : vector<2x32xf32>
      %cst_28 = arith.constant 1.000000e+00 : f32
      %34 = vector.broadcast %cst_28 : f32 to vector<2x32xf32>
      %35 = arith.addf %34, %33 : vector<2x32xf32>
      %36 = arith.divf %34, %35 : vector<2x32xf32>
      %37 = vector.shape_cast %36 : vector<2x32xf32> to vector<2x1x32xf32>
      %c0_29 = arith.constant 0 : index
      %c0_30 = arith.constant 0 : index
      %c0_31 = arith.constant 0 : index
      %38 = vector.load %arg5[%c0_29, %c0_30, %c0_31] : memref<2x1x32xf32, #tpu.memory_space<vmem>>, vector<2x1x32xf32>
      tpu.vector_store %arg5[%c0_29, %c0_30, %c0_31], %37 {strides = array<i32>} : memref<2x1x32xf32, #tpu.memory_space<vmem>>, vector<2x1x32xf32>,
    } else {
    }
    return
  }
  func.func @transform_0(%arg0: i32, %arg1: i32) -> (i32, i32, i32) {
    %c0_i32 = arith.constant 0 : i32
    %c0_i32_0 = arith.constant 0 : i32
    return %arg0, %c0_i32, %arg1 : i32, i32, i32
  }
  func.func @transform_1(%arg0: i32, %arg1: i32) -> (i32, i32) {
    %c0_i32 = arith.constant 0 : i32
    %c0_i32_0 = arith.constant 0 : i32
    %c0_i32_1 = arith.constant 0 : i32
    return %c0_i32, %c0_i32_0 : i32, i32
  }
  func.func @transform_2(%arg0: i32, %arg1: i32) -> (i32, i32) {
    %c0_i32 = arith.constant 0 : i32
    %c0_i32_0 = arith.constant 0 : i32
    %c0_i32_1 = arith.constant 0 : i32
    return %c0_i32, %c0_i32_0 : i32, i32
  }
  func.func @transform_3(%arg0: i32, %arg1: i32) -> (i32, i32, i32) {
    %c0_i32 = arith.constant 0 : i32
    %c0_i32_0 = arith.constant 0 : i32
    %c0_i32_1 = arith.constant 0 : i32
    return %arg0, %c0_i32, %c0_i32_0 : i32, i32, i32
  }
}

</mosaic_0001>

<bundles_post_ra>
// kernel: tpu_custom_call.1
= control target key start
LH: loop header
LB: loop body
LE: loop exit
PB: predicated region body
PF: predicated region fallthrough
CT: control target
= control target key end

     0   :  { %8 = vsyncpa [#allocation5], 0  ;;  %s699_s0 = inlined_call_operand.hbm [shape: f32[2,32,256], index: 0, kind: input, shape index: {}]   ;;  %s700_s1 = inlined_call_operand.vmem [shape: f32[32,2], index: 1, kind: input, shape index: {}]   ;;  %s701_s2 = inlined_call_operand.vmem [shape: f32[2,32], index: 2, kind: input, shape index: {}]   ;;  %s702_s3 = inlined_call_operand.hbm [shape: f32[2,1,32], index: 3, kind: output, shape index: {}]  }
   0x1   :  { %9 = vsyncpa [#allocation6], 0  ;;  %s603_s12 = smov [#allocation4]  }
   0x2   :  { %s15_s13 = sshll.u32 %s603_s12, 4  ;;  %s16_s13 = int_to_ptr.vmem [resolvable:$true] %s15_s13 }
   0x3   :  { %s567_s14 = scalar_lea.vmem %s16_s13, 2048  ;;  %p572_p1 = scmp.lt.s32.totalorder %s16_s13, %s16_s13 }
   0x4   :  { %p568_p0 = scmp.ne.s32.totalorder %s16_s13, %s567_s14  ;;  %p573_p2 = scmp.lt.s32.totalorder %s567_s14, %s567_s14 }
   0x6   :  { %p574_p3 = por %p573_p2, %p572_p1 }
   0x8   :  { %p575_p4 = pnand %p574_p3, %p568_p0 }
   0xa   :  { %578 = shalt.err (!%p575_p4)
}
   0xb   :  { %s604_s15 = smov 256   ;;  %s605_s16 = smov 16  }
   0xc   :  { %21 = dma.hbm_to_vmem [thread:$0]  %s699_s0, 2048, %s16_s13, [#allocation5], %s604_s15, %s604_s15, %s605_s16  }
   0xd   :  { %599 = dma.done.wait [#allocation5], 2048  }
   0xe   :  { %600 = vsyncadd [#allocation5], 4294965248  ;;  %v44_v0 = vld [vmem:[#allocation4 + $0x40] sm:$0xff]  ;;  %v45_v1 = vld [vmem:[#allocation4 + $0x48] sm:$0xff]  ;;  %vm33_vm0 = vcmask 254976   ;;  %v606_v28 = vmov 0.0   ;;  %v85_v38 = vlaneseq }
   0xf   :  { %v36_v2 = vld [vmem:[#allocation4] sm:$0xff]  ;;  %v65_v3 = vadd.f32 %v45_v1, %v44_v0  ;;  %v37_v4 = vld [vmem:[#allocation4 + $0x8] sm:$0xff]  ;;  %v46_v5 = vld [vmem:[#allocation4 + $0x50] sm:$0xff]  ;;  %v150_v27 = vmax.f32 %v44_v0, %v45_v1  ;;  %34 = vst.msk [vmem:[#allocation2] sm:$0x3] %vm33_vm0, %v606_v28  ;;  %519 = vmatprep.subr.mxu0 %v606_v28  ;;  %530 = vmatprep.subr.mxu1 %v606_v28  ;;  %v607_v36 = vmov -inf  }
  0x10   :  { %v47_v6 = vld [vmem:[#allocation4 + $0x58] sm:$0xff]  ;;  %v53_v7 = vadd.f32 %v37_v4, %v36_v2  ;;  %v38_v8 = vld [vmem:[#allocation4 + $0x10] sm:$0xff]  ;;  %v48_v12 = vld [vmem:[#allocation4 + $0x60] sm:$0xff]  ;;  %v138_v25 = vmax.f32 %v36_v2, %v37_v4  ;;  %35 = vst.msk [vmem:[#allocation3] sm:$0x3] %vm33_vm0, %v607_v36  ;;  %vm608_vm1 = vmmov 0  }
  0x11   :  { %v39_v9 = vld [vmem:[#allocation4 + $0x18] sm:$0xff]  ;;  %66 = vadd.xlane.f32.xlu1 %v65_v3  ;;  %v68_v10 = vadd.f32 %v47_v6, %v46_v5  ;;  %v49_v13 = vld [vmem:[#allocation4 + $0x68] sm:$0xff]  ;;  %v40_v14 = vld [vmem:[#allocation4 + $0x20] sm:$0xff]  ;;  %v153_v26 = vmax.f32 %v46_v5, %v47_v6  ;;  %527 = vmatprep.mubr.msk.f32.mxu0 %vm608_vm1, %v606_v28  ;;  %v86_v39 = vand.u32 127, %v85_v38  ;;  %v664_v44 = vshrl.u32 %v85_v38, 7 }
  0x12   :  { %54 = vadd.xlane.f32.xlu0 %v53_v7  ;;  %v56_v11 = vadd.f32 %v39_v9, %v38_v8  ;;  %v41_v15 = vld [vmem:[#allocation4 + $0x28] sm:$0xff]  ;;  %v71_v16 = vadd.f32 %v49_v13, %v48_v12  ;;  %v50_v18 = vld [vmem:[#allocation4 + $0x70] sm:$0xff]  ;;  %v51_v19 = vld [vmem:[#allocation4 + $0x78] sm:$0xff]  ;;  %v141_v24 = vmax.f32 %v38_v8, %v39_v9  ;;  %v156_v29 = vmax.f32 %v48_v12, %v49_v13 }
  0x13   :  { %v59_v17 = vadd.f32 %v41_v15, %v40_v14  ;;  %v42_v20 = vld [vmem:[#allocation4 + $0x30] sm:$0xff]  ;;  %v43_v21 = vld [vmem:[#allocation4 + $0x38] sm:$0xff]  ;;  %v74_v22 = vadd.f32 %v51_v19, %v50_v18  ;;  %v144_v30 = vmax.f32 %v40_v14, %v41_v15  ;;  %v159_v31 = vmax.f32 %v50_v18, %v51_v19  ;;  %v219_v35 = vld [vmem:[%s700_s1 + $0x8] sm:$0xff]  ;;  %538 = vmatprep.mubr.msk.f32.mxu1 %vm608_vm1, %v606_v28 }
  0x14   :  { %v62_v23 = vadd.f32 %v43_v21, %v42_v20  ;;  %v147_v32 = vmax.f32 %v42_v20, %v43_v21  ;;  %v221_v33 = vld [vmem:[%s700_s1 + $0x18] sm:$0xff]  ;;  %v220_v34 = vld [vmem:[%s700_s1 + $0x10] sm:$0xff]  ;;  %v218_v37 = vld [vmem:[%s700_s1] sm:$0xff]  ;;  %v91_v42 = vadd.s32 4294967288, %v86_v39  ;;  %v98_v43 = vadd.s32 4294967280, %v86_v39 }
  0x15   :  { %69 = vadd.xlane.f32.xlu1 %v68_v10  ;;  %520 = vmatpush3.msra.mxu0 %v221_v33  ;;  %v105_v48 = vadd.s32 4294967272, %v86_v39  ;;  %v89_v50 = vsub.s32 %v86_v39, %v664_v44  ;;  %vm96_vm2 = vcmask 130112   ;;  %vm103_vm3 = vcmask 195712   ;;  %v222_v38 = vld [vmem:[%s701_s2] sm:$0x3]  ;;  %s610_s2 = smov [#allocation7]  }
  0x16   :  { %57 = vadd.xlane.f32.xlu0 %v56_v11  ;;  %531 = vmatpush3.msra.mxu1 %v221_v33  ;;  %v94_v46 = vsub.s32 %v91_v42, %v664_v44  ;;  %v101_v49 = vsub.s32 %v98_v43, %v664_v44  ;;  %vm110_vm4 = vcmask 261312   ;;  %vm131_vm5 = vcmask 1041409   ;;  %v52_v5 = vld [vmem:[#allocation2] sm:$0x3]  ;;  %s490_s27 = sshll.u32 %s610_s2, 4  ;;  %s491_s27 = int_to_ptr.vmem [resolvable:$true] %s490_s27 }
  0x17   :  { %521 = vmatprep.subr.mxu0 %v606_v28  ;;  %532 = vmatprep.subr.mxu1 %v606_v28  ;;  %v108_v54 = vsub.s32 %v105_v48, %v664_v44  ;;  %vm223_vm6 = vcmask 261120   ;;  %v137_v33 = vld [vmem:[#allocation3] sm:$0x3]  ;;  %vm377_vm7 = vcmask 1041408   ;;  %vm373_vm8 = vcmask 15360   ;;  %s579_s28 = scalar_lea.vmem %s491_s27, 32  ;;  %p584_p6 = scmp.lt.s32.totalorder %s491_s27, %s491_s27 }
  0x18   :  { %522 = vmatpush3.msra.mxu0 %v220_v34  ;;  %533 = vmatpush3.msra.mxu1 %v220_v34  ;;  %vm482_vm9 = vcmask 253952   ;;  %p580_p5 = scmp.ne.s32.totalorder %s491_s27, %s579_s28  ;;  %p585_p7 = scmp.lt.s32.totalorder %s579_s28, %s579_s28 }
  0x19   :  { %72 = vadd.xlane.f32.xlu1 %v71_v16  ;;  %523 = vmatprep.subr.mxu0 %v606_v28 }
  0x1a   :  { %60 = vadd.xlane.f32.xlu0 %v59_v17  ;;  %534 = vmatprep.subr.mxu1 %v606_v28  ;;  %p586_p8 = por %p585_p7, %p584_p6 }
  0x1b   :  { %524 = vmatpush3.msra.mxu0 %v219_v35  ;;  %535 = vmatpush3.msra.mxu1 %v219_v35 }
  0x1c   :  { %525 = vmatprep.subr.mxu0 %v606_v28  ;;  %536 = vmatprep.subr.mxu1 %v606_v28  ;;  %p587_p9 = pnand %p586_p8, %p580_p5 }
  0x1d   :  { %75 = vadd.xlane.f32.xlu1 %v74_v22  ;;  %526 = vmatpush3.msra.mxu0 %v218_v37 }
  0x1e   :  { %63 = vadd.xlane.f32.xlu0 %v62_v23  ;;  %537 = vmatpush3.msra.mxu1 %v218_v37 }
  0x1f   :  { %541 = vmatprep.subr.mxu0 %v606_v28 }
  0x21   :  { %142 = vmax.xlane.f32.xlu1 %v141_v24 }
  0x22   :  { %139 = vmax.xlane.f32.xlu0 %v138_v25 }
  0x25   :  { %154 = vmax.xlane.f32.xlu1 %v153_v26 }
  0x26   :  { %151 = vmax.xlane.f32.xlu0 %v150_v27 }
  0x29   :  { %157 = vmax.xlane.f32.xlu1 %v156_v29 }
  0x2a   :  { %145 = vmax.xlane.f32.xlu0 %v144_v30 }
  0x2d   :  { %160 = vmax.xlane.f32.xlu1 %v159_v31 }
  0x2e   :  { %148 = vmax.xlane.f32.xlu0 %v147_v32 }
  0x9a   :  { %v67_v40 = vpop.xlane.xlu1 %66 }
  0x9b   :  { %v55_v41 = vpop.xlane.xlu0 %54  ;;  %v115_v57 = vrot.slane %v67_v40, %v89_v50 }
  0x9c   :  { %v90_v59 = vrot.slane %v55_v41, %v89_v50 }
  0x9e   :  { %v70_v45 = vpop.xlane.xlu1 %69 }
  0x9f   :  { %v58_v47 = vpop.xlane.xlu0 %57  ;;  %v119_v52 = vrot.slane %v70_v45, %v94_v46 }
  0xa0   :  { %v95_v55 = vrot.slane %v58_v47, %v94_v46 }
  0xa1   :  { %v120_v61 = vsel %vm96_vm2, %v119_v52, %v115_v57 }
  0xa2   :  { %v73_v51 = vpop.xlane.xlu1 %72  ;;  %v97_v0 = vsel %vm96_vm2, %v95_v55, %v90_v59 }
  0xa3   :  { %v61_v53 = vpop.xlane.xlu0 %60  ;;  %v124_v56 = vrot.slane %v73_v51, %v101_v49  ;;  %v609_v51 = vmov 1966171168  }
  0xa4   :  { %v102_v58 = vrot.slane %v61_v53, %v101_v49  ;;  %v459_v52 = vunpack.c.l.s4 %v609_v51 }
  0xa5   :  { %v125_v1 = vsel %vm103_vm3, %v124_v56, %v120_v61 }
  0xa6   :  { %v76_v60 = vpop.xlane.xlu1 %75  ;;  %v104_v3 = vsel %vm103_vm3, %v102_v58, %v97_v0  ;;  %v460_v53 = vunpack.c.0.s8 %v459_v52 }
  0xa7   :  { %v129_v62 = vrot.slane %v76_v60, %v108_v54  ;;  %v64_v63 = vpop.xlane.xlu0 %63 }
  0xa8   :  { %v109_v2 = vrot.slane %v64_v63, %v108_v54 }
  0xa9   :  { %v130_v4 = vsel %vm110_vm4, %v129_v62, %v125_v1 }
  0xaa   :  { %v111_v6 = vsel %vm110_vm4, %v109_v2, %v104_v3  ;;  %v143_v7 = vpop.xlane.xlu1 %142 }
  0xab   :  { %v132_v8 = vsel %vm131_vm5, %v130_v4, %v111_v6  ;;  %v140_v9 = vpop.xlane.xlu0 %139  ;;  %v177_v17 = vrot.slane %v143_v7, %v94_v46 }
  0xac   :  { %v134_v10 = vadd.f32 %v132_v8, %v52_v5  ;;  %v173_v18 = vrot.slane %v140_v9, %v89_v50 }
  0xae   :  { %136 = vst.msk [vmem:[#allocation2] sm:$0x3] %vm33_vm0, %v134_v10  ;;  %v155_v11 = vpop.xlane.xlu1 %154  ;;  %v178_v27 = vsel %vm96_vm2, %v177_v17, %v173_v18 }
  0xaf   :  { %v152_v12 = vpop.xlane.xlu0 %151  ;;  %v196_v14 = vrot.slane %v155_v11, %v94_v46 }
  0xb0   :  { %v192_v15 = vrot.slane %v152_v12, %v89_v50 }
  0xb2   :  { %v158_v13 = vpop.xlane.xlu1 %157  ;;  %v197_v24 = vsel %vm96_vm2, %v196_v14, %v192_v15 }
  0xb3   :  { %v146_v16 = vpop.xlane.xlu0 %145  ;;  %v201_v19 = vrot.slane %v158_v13, %v101_v49 }
  0xb4   :  { %v182_v20 = vrot.slane %v146_v16, %v101_v49 }
  0xb5   :  { %v215_v21 = vld [vmem:[#allocation2] sm:$0x3]  ;;  %v202_v29 = vsel %vm103_vm3, %v201_v19, %v197_v24 }
  0xb6   :  { %v161_v22 = vpop.xlane.xlu1 %160  ;;  %v216_v23 = vmul.f32 0.00390625, %v215_v21  ;;  %v183_v31 = vsel %vm103_vm3, %v182_v20, %v178_v27 }
  0xb7   :  { %v206_v25 = vrot.slane %v161_v22, %v108_v54  ;;  %v149_v26 = vpop.xlane.xlu0 %148 }
  0xb8   :  { %v187_v30 = vrot.slane %v149_v26, %v108_v54  ;;  %528 = vmatmul.mubr.msk.f32.vlgmr.msra.gmra.mxu0 %vm223_vm6, %v216_v23  ;;  %v463_v54 = vsub.s32 %v460_v53, %v664_v44 }
  0xb9   :  { %v207_v32 = vsel %vm110_vm4, %v206_v25, %v202_v29  ;;  %543 = vmatprep.mubr.msk.f32.mxu0 %vm608_vm1, %v606_v28  ;;  %542 = vmatpush3.msk.msra.mxu0 %vm377_vm7, %v222_v38 }
  0xba   :  { %v188_v34 = vsel %vm110_vm4, %v187_v30, %v183_v31 }
  0xbb   :  { %v208_v35 = vsel %vm131_vm5, %v207_v32, %v188_v34 }
  0xbc   :  { %v210_v36 = vmax.f32 %v137_v33, %v208_v35 }
  0xbe   :  { %211 = vst.msk [vmem:[#allocation3] sm:$0x3] %vm33_vm0, %v210_v36 }
  0xc5   :  { %v217_v37 = vld [vmem:[#allocation3] sm:$0x3] }
  0xc6   :  { %539 = vmatmul.mubr.msk.f32.vlgmr.msra.gmra.mxu1 %vm223_vm6, %v217_v37 }
 0x178   :  { %v293_v39 = vpop.f32.mrf.mxu0 }
 0x179   :  { %v297_v28 = vmax.f32 %v293_v39, 0.0 }
 0x17a   :  { %v529_v40 = vpop.f32.mrf.mxu0 }
 0x186   :  { %v367_v41 = vpop.f32.mrf.mxu1 }
 0x187   :  { %v371_v42 = vmax.f32 %v367_v41, 0.0 }
 0x188   :  { %v540_v43 = vpop.f32.mrf.mxu1 }
 0x189   :  { %v372_v45 = vadd.f32 %v371_v42, %v297_v28 }
 0x18b   :  { %544 = vmatmul.mubr.msk.f32.vlgmr.msra.gmra.mxu0 %vm373_vm8, %v372_v45 }
 0x24b   :  { %v447_v46 = vpop.f32.mrf.mxu0 }
 0x24c   :  { %v506_v47 = vmul.f32 -1.442695, %v447_v46 }
 0x24d   :  { %v545_v48 = vpop.f32.mrf.mxu0 }
 0x24e   :  { %555 = vpow2.f32 %v506_v47 }
 0x25b   :  { %v556_v49 = vpop.eup %555 }
 0x25c   :  { %v454_v50 = vadd.f32 1.0, %v556_v49 }
 0x25e   :  { %557 = vrcp.f32 %v454_v50 }
 0x26b   :  { %v558_v55 = vpop.eup %557 }
 0x26c   :  { %v464_v56 = vrot.slane %v558_v55, %v463_v54 }
 0x26e   :  { %v465_v57 = vcombine.high %v464_v56, %v464_v56  ;;  %v472_v58 = vrot.slane %v464_v56, %v463_v54 }
 0x270   :  { %v479_v59 = vrot.slane %v465_v57, %v463_v54  ;;  %483 = vst.msk [vmem:[#allocation7] sm:$0x1] %vm482_vm9, %v472_v58 }
 0x272   :  { %484 = vst.msk [vmem:[#allocation7 + $0x1] sm:$0x1] %vm482_vm9, %v479_v59 }
 0x273   :  { %590 = shalt.err (!%p587_p9)
}
 0x274   :  { %s611_s29 = smov 1  }
 0x275   :  { %496 = dma.vmem_to_hbm [thread:$0]  %s491_s27, 32, %s702_s3, [#allocation6], %s605_s16, %s605_s16, %s611_s29  }
 0x276   :  { %601 = dma.done.wait [#allocation6], 32  }
 0x277   :  { %602 = vsyncadd [#allocation6], 4294967264 }
 0x278   :  { %500 = vsyncpa [#allocation5], 1 }
 0x279   :  { %501 = vsyncpa [#allocation6], 1 }

</bundles_post_ra>
